<compile_context>
chip_gen: v7x
topology: tpu7x:2x2x1
jax: 0.10.0
libtpu: 0.0.40
codegen_flags: <defaults>
</compile_context>

<pallas_src>
import math
import functools

import jax
import jax.numpy as jnp
from jax.experimental import pallas as pl
from jax.experimental.pallas import tpu as pltpu

LANE = 128  # lane-dense output width (vreg lane count)


# ----------------------------------------------------------------------------
# Fused kernel: simpleDNN backbone (relu x3, lin4, F.normalize) + ArcMargin head
# ----------------------------------------------------------------------------
def _fused_kernel(x_ref, w1_ref, b1_ref, w2_ref, b2_ref, w3_ref, b3_ref,
                  w4_ref, b4_ref, arcw_ref, label_ref,
                  feat_ref, logit_ref, *, s, cos_m, sin_m, th, mm, use_bf16):

    def mm_cast(a):
        # bf16 MXU operands on v6e/v7x; accumulation stays f32.
        return a.astype(jnp.bfloat16) if use_bf16 else a

    x = x_ref[...]                                                    # (tm, 17)
    h = jnp.dot(mm_cast(x), mm_cast(w1_ref[...]),
                preferred_element_type=jnp.float32) + b1_ref[...]
    h = jnp.maximum(h, 0.0)
    h = jnp.dot(mm_cast(h), mm_cast(w2_ref[...]),
                preferred_element_type=jnp.float32) + b2_ref[...]
    h = jnp.maximum(h, 0.0)
    h = jnp.dot(mm_cast(h), mm_cast(w3_ref[...]),
                preferred_element_type=jnp.float32) + b3_ref[...]
    h = jnp.maximum(h, 0.0)
    # lin4 computed directly into a 128-lane-wide tile (cols >= 17 are zero
    # because w4/b4 are zero-padded in the wrapper).
    y = jnp.dot(mm_cast(h), mm_cast(w4_ref[...]),
                preferred_element_type=jnp.float32) + b4_ref[...]     # (tm, 128)

    # F.normalize(y, dim=1) == y / max(||y||, 1e-12); rsqrt runs on the EUP.
    inv_n = jax.lax.rsqrt(jnp.maximum(jnp.sum(y * y, axis=1, keepdims=True),
                                      1e-24))
    feat = y * inv_n
    feat_ref[...] = feat

    # --- ArcMarginProduct.forward(feat, label), easy_margin=False -----------
    # Re-normalize feat exactly as forwardArc does (feat is already unit-norm,
    # this is a cheap EUP op kept for parity with F.normalize applied twice).
    inv_n2 = jax.lax.rsqrt(jnp.maximum(
        jnp.sum(feat * feat, axis=1, keepdims=True), 1e-24))
    xn = feat * inv_n2
    # arcw_ref holds the pre-normalized arc weight, transposed and zero-padded
    # to (128, 128): padded rows/cols are zero, so cosine cols >= 2 are zero.
    cosine = jnp.dot(mm_cast(xn), mm_cast(arcw_ref[...]),
                     preferred_element_type=jnp.float32)              # (tm, 128)

    # Matches the spec exactly: sqrt(1 - clamp(cos^2, max=1) + 1e-6)
    sine = jnp.sqrt(1.0 - jnp.minimum(cosine * cosine, 1.0) + 1e-6)
    phi = cosine * cos_m - sine * sin_m
    phi = jnp.where(cosine - th > 0, phi, cosine - mm)

    # one_hot via column iota vs per-row label.  Label stays in a (tm, 1) VMEM
    # block: Mosaic cannot load an SMEM vector into vregs for this compare, so
    # scalar-prefetch/SMEM is not usable here; the DMA is tm*4 bytes.
    col = jax.lax.broadcasted_iota(jnp.int32, cosine.shape, 1)
    one_hot = (col == label_ref[...]).astype(jnp.float32)
    logit_ref[...] = (one_hot * phi + (1.0 - one_hot) * cosine) * s


# ----------------------------------------------------------------------------
# Wrapper: MyFinalArcface.forward + forwardArc fused
# ----------------------------------------------------------------------------
@functools.partial(jax.jit, static_argnames=("s", "m", "tm", "use_bf16"))
def my_final_arcface_forward(x, label, backbone_params, arc_weight, *,
                             s=32.0, m=0.5, tm=64, use_bf16=False):
    (w1, b1), (w2, b2), (w3, b3), (w4, b4) = backbone_params
    B, in_feat = x.shape
    inner = w1.shape[1]
    out_feat = w4.shape[1]          # 17
    arc_out = arc_weight.shape[0]   # 2

    tm = min(tm, B)
    assert B % tm == 0 and tm % 8 == 0, "batch tile must divide B and be 8-aligned"

    # Lane-dense padding of the two output heads.
    w4_pad = jnp.zeros((inner, LANE), jnp.float32).at[:, :out_feat].set(w4)
    b4_pad = jnp.zeros((1, LANE), jnp.float32).at[:, :out_feat].set(b4)

    # Pre-normalize the (static) arc weight once; pad/transpose to a full
    # (128, 128) MXU tile so the in-kernel cosine matmul is non-degenerate.
    wn = arc_weight / jnp.maximum(
        jnp.sqrt(jnp.sum(arc_weight * arc_weight, axis=1, keepdims=True)), 1e-12)
    arcw_pad = jnp.zeros((LANE, LANE), jnp.float32).at[:out_feat, :arc_out].set(wn.T)

    label2d = label.reshape(B, 1).astype(jnp.int32)

    kern = functools.partial(
        _fused_kernel,
        s=s,
        cos_m=math.cos(m),
        sin_m=math.sin(m),
        th=math.cos(math.pi - m),
        mm=math.sin(math.pi - m) * m,
        use_bf16=use_bf16,
    )

    def resident(shape):  # weights/biases: same block every grid step (VMEM-resident)
        return pl.BlockSpec(shape, lambda i, _shape=shape: (0,) * len(_shape))

    def batched(shape):   # batch-tiled arrays
        return pl.BlockSpec(shape, lambda i, _n=len(shape): (i,) + (0,) * (_n - 1))

    feat_pad, logit_pad = pl.pallas_call(
        kern,
        out_shape=(jax.ShapeDtypeStruct((B, LANE), jnp.float32),
                   jax.ShapeDtypeStruct((B, LANE), jnp.float32)),
        grid_spec=pltpu.PrefetchScalarGridSpec(
            num_scalar_prefetch=0,
            grid=(B // tm,),
            in_specs=[
                batched((tm, in_feat)),
                resident(w1.shape), resident(b1.shape),
                resident(w2.shape), resident(b2.shape),
                resident(w3.shape), resident(b3.shape),
                resident(w4_pad.shape), resident(b4_pad.shape),
                resident(arcw_pad.shape),
                batched((tm, 1)),
            ],
            out_specs=(batched((tm, LANE)), batched((tm, LANE))),
        ),
        compiler_params=pltpu.CompilerParams(
            dimension_semantics=("parallel",)),
    )(x, w1, b1, w2, b2, w3, b3, w4_pad, b4_pad, arcw_pad, label2d)

    feat = feat_pad[:, :out_feat]     # (B, 17)  == MyFinalArcface.forward(x)
    logits = logit_pad[:, :arc_out]   # (B, 2)   == MyFinalArcface.forwardArc(feat, label)
    return feat, logits


# ----------------------------------------------------------------------------
# Deterministic parameter init (synthetic, not a checkpoint load)
# ----------------------------------------------------------------------------
def init_params(key, inner=64, in_feat=17, out_feat=17, arc_out=2):
    dims = [(in_feat, inner), (inner, inner), (inner, inner), (inner, out_feat)]
    params = []
    for (fan_in, fan_out) in dims:
        key, kw, kb = jax.random.split(key, 3)
        bound = 1.0 / math.sqrt(fan_in)
        w = jax.random.uniform(kw, (fan_in, fan_out), jnp.float32, -bound, bound)
        b = jax.random.uniform(kb, (1, fan_out), jnp.float32, -bound, bound)
        params.append((w, b))
    # ArcMarginProduct weight: (out_feature=2, in_feature=17), xavier-uniform-ish
    key, ka = jax.random.split(key)
    a = math.sqrt(6.0 / (arc_out + out_feat))
    arc_w = jax.random.uniform(ka, (arc_out, out_feat), jnp.float32, -a, a)
    return tuple(params), arc_w


if __name__ == "__main__":
    key = jax.random.PRNGKey(0)
    k_params, k_x, k_lbl = jax.random.split(key, 3)

    B, IN_FEAT, INNER = 128, 17, 64
    params, arc_w = init_params(k_params, inner=INNER, in_feat=IN_FEAT)

    x = jax.random.normal(k_x, (B, IN_FEAT), jnp.float32)
    label = jax.random.randint(k_lbl, (B,), 0, 2, jnp.int32)

    # Fused MyFinalArcface.forward + forwardArc
    feat, logits = my_final_arcface_forward(x, label, params, arc_w,
                                            s=32.0, m=0.5, tm=64)
    feat, logits = jax.block_until_ready((feat, logits))

    assert feat.shape == (B, 17) and logits.shape == (B, 2)
    assert bool(jnp.all(jnp.isfinite(feat))) and bool(jnp.all(jnp.isfinite(logits)))
    print("KERNEL_OK")
</pallas_src>

<mosaic_0001>
module attributes {stable_mosaic.version = 11 : i64} {
  func.func @_fused_kernel(%arg0: i32, %arg1: memref<64x17xf32, #tpu.memory_space<vmem>>, %arg2: memref<17x64xf32, #tpu.memory_space<vmem>>, %arg3: memref<1x64xf32, #tpu.memory_space<vmem>>, %arg4: memref<64x64xf32, #tpu.memory_space<vmem>>, %arg5: memref<1x64xf32, #tpu.memory_space<vmem>>, %arg6: memref<64x64xf32, #tpu.memory_space<vmem>>, %arg7: memref<1x64xf32, #tpu.memory_space<vmem>>, %arg8: memref<64x128xf32, #tpu.memory_space<vmem>>, %arg9: memref<1x128xf32, #tpu.memory_space<vmem>>, %arg10: memref<128x128xf32, #tpu.memory_space<vmem>>, %arg11: memref<64x1xi32, #tpu.memory_space<vmem>>, %arg12: memref<64x128xf32, #tpu.memory_space<vmem>>, %arg13: memref<64x128xf32, #tpu.memory_space<vmem>>) attributes {dimension_semantics = [#tpu.dimension_semantics<parallel>], iteration_bounds = array<i64: 2>, scalar_prefetch = 0 : i64, scratch_operands = 0 : i64, tpu.core_type = #tpu.core_type<tc>, window_params = [{transform_indices = @transform_0, window_bounds = array<i64: 64, 17>}, {pipeline_mode = #tpu.pipeline_mode<synchronous>, transform_indices = @transform_1, window_bounds = array<i64: 17, 64>}, {pipeline_mode = #tpu.pipeline_mode<synchronous>, transform_indices = @transform_2, window_bounds = array<i64: 1, 64>}, {pipeline_mode = #tpu.pipeline_mode<synchronous>, transform_indices = @transform_3, window_bounds = array<i64: 64, 64>}, {pipeline_mode = #tpu.pipeline_mode<synchronous>, transform_indices = @transform_4, window_bounds = array<i64: 1, 64>}, {pipeline_mode = #tpu.pipeline_mode<synchronous>, transform_indices = @transform_5, window_bounds = array<i64: 64, 64>}, {pipeline_mode = #tpu.pipeline_mode<synchronous>, transform_indices = @transform_6, window_bounds = array<i64: 1, 64>}, {pipeline_mode = #tpu.pipeline_mode<synchronous>, transform_indices = @transform_7, window_bounds = array<i64: 64, 128>}, {pipeline_mode = #tpu.pipeline_mode<synchronous>, transform_indices = @transform_8, window_bounds = array<i64: 1, 128>}, {pipeline_mode = #tpu.pipeline_mode<synchronous>, transform_indices = @transform_9, window_bounds = array<i64: 128, 128>}, {transform_indices = @transform_10, window_bounds = array<i64: 64, 1>}, {transform_indices = @transform_11, window_bounds = array<i64: 64, 128>}, {transform_indices = @transform_12, window_bounds = array<i64: 64, 128>}]} {
    %c0 = arith.constant 0 : index
    %c0_0 = arith.constant 0 : index
    %0 = vector.load %arg1[%c0, %c0_0] : memref<64x17xf32, #tpu.memory_space<vmem>>, vector<64x17xf32>
    %c0_1 = arith.constant 0 : index
    %c0_2 = arith.constant 0 : index
    %1 = vector.load %arg2[%c0_1, %c0_2] : memref<17x64xf32, #tpu.memory_space<vmem>>, vector<17x64xf32>
    %cst = arith.constant dense<0.000000e+00> : vector<64x64xf32>
    %2 = tpu.matmul %0, %1, %cst {dimension_numbers = #tpu.dot_dimension_numbers<[1], [0], [0], [1], [0, 0, 1, 1], [], []>} : vector<64x17xf32>, vector<17x64xf32>, vector<64x64xf32> -> vector<64x64xf32>
    %c0_3 = arith.constant 0 : index
    %c0_4 = arith.constant 0 : index
    %3 = vector.load %arg3[%c0_3, %c0_4] : memref<1x64xf32, #tpu.memory_space<vmem>>, vector<1x64xf32>
    %4 = vector.broadcast %3 : vector<1x64xf32> to vector<64x64xf32>
    %5 = arith.addf %2, %4 : vector<64x64xf32>
    %cst_5 = arith.constant 0.000000e+00 : f32
    %6 = vector.broadcast %cst_5 : f32 to vector<64x64xf32>
    %7 = arith.maximumf %5, %6 : vector<64x64xf32>
    %c0_6 = arith.constant 0 : index
    %c0_7 = arith.constant 0 : index
    %8 = vector.load %arg4[%c0_6, %c0_7] : memref<64x64xf32, #tpu.memory_space<vmem>>, vector<64x64xf32>
    %cst_8 = arith.constant dense<0.000000e+00> : vector<64x64xf32>
    %9 = tpu.matmul %7, %8, %cst_8 {dimension_numbers = #tpu.dot_dimension_numbers<[1], [0], [0], [1], [0, 0, 1, 1], [], []>} : vector<64x64xf32>, vector<64x64xf32>, vector<64x64xf32> -> vector<64x64xf32>
    %c0_9 = arith.constant 0 : index
    %c0_10 = arith.constant 0 : index
    %10 = vector.load %arg5[%c0_9, %c0_10] : memref<1x64xf32, #tpu.memory_space<vmem>>, vector<1x64xf32>
    %11 = vector.broadcast %10 : vector<1x64xf32> to vector<64x64xf32>
    %12 = arith.addf %9, %11 : vector<64x64xf32>
    %cst_11 = arith.constant 0.000000e+00 : f32
    %13 = vector.broadcast %cst_11 : f32 to vector<64x64xf32>
    %14 = arith.maximumf %12, %13 : vector<64x64xf32>
    %c0_12 = arith.constant 0 : index
    %c0_13 = arith.constant 0 : index
    %15 = vector.load %arg6[%c0_12, %c0_13] : memref<64x64xf32, #tpu.memory_space<vmem>>, vector<64x64xf32>
    %cst_14 = arith.constant dense<0.000000e+00> : vector<64x64xf32>
    %16 = tpu.matmul %14, %15, %cst_14 {dimension_numbers = #tpu.dot_dimension_numbers<[1], [0], [0], [1], [0, 0, 1, 1], [], []>} : vector<64x64xf32>, vector<64x64xf32>, vector<64x64xf32> -> vector<64x64xf32>
    %c0_15 = arith.constant 0 : index
    %c0_16 = arith.constant 0 : index
    %17 = vector.load %arg7[%c0_15, %c0_16] : memref<1x64xf32, #tpu.memory_space<vmem>>, vector<1x64xf32>
    %18 = vector.broadcast %17 : vector<1x64xf32> to vector<64x64xf32>
    %19 = arith.addf %16, %18 : vector<64x64xf32>
    %cst_17 = arith.constant 0.000000e+00 : f32
    %20 = vector.broadcast %cst_17 : f32 to vector<64x64xf32>
    %21 = arith.maximumf %19, %20 : vector<64x64xf32>
    %c0_18 = arith.constant 0 : index
    %c0_19 = arith.constant 0 : index
    %22 = vector.load %arg8[%c0_18, %c0_19] : memref<64x128xf32, #tpu.memory_space<vmem>>, vector<64x128xf32>
    %cst_20 = arith.constant dense<0.000000e+00> : vector<64x128xf32>
    %23 = tpu.matmul %21, %22, %cst_20 {dimension_numbers = #tpu.dot_dimension_numbers<[1], [0], [0], [1], [0, 0, 1, 1], [], []>} : vector<64x64xf32>, vector<64x128xf32>, vector<64x128xf32> -> vector<64x128xf32>
    %c0_21 = arith.constant 0 : index
    %c0_22 = arith.constant 0 : index
    %24 = vector.load %arg9[%c0_21, %c0_22] : memref<1x128xf32, #tpu.memory_space<vmem>>, vector<1x128xf32>
    %25 = vector.broadcast %24 : vector<1x128xf32> to vector<64x128xf32>
    %26 = arith.addf %23, %25 : vector<64x128xf32>
    %27 = arith.mulf %26, %26 : vector<64x128xf32>
    %cst_23 = arith.constant dense<0.000000e+00> : vector<64xf32>
    %28 = vector.multi_reduction <add>, %27, %cst_23 [1] : vector<64x128xf32> to vector<64xf32>
    %29 = vector.shape_cast %28 : vector<64xf32> to vector<64x1xf32>
    %cst_24 = arith.constant 1.000000e-24 : f32
    %30 = vector.broadcast %cst_24 : f32 to vector<64x1xf32>
    %31 = arith.maximumf %29, %30 : vector<64x1xf32>
    %32 = math.rsqrt %31 : vector<64x1xf32>
    %33 = vector.broadcast %32 : vector<64x1xf32> to vector<64x128xf32>
    %34 = arith.mulf %26, %33 : vector<64x128xf32>
    %c0_25 = arith.constant 0 : index
    %c0_26 = arith.constant 0 : index
    %35 = vector.load %arg12[%c0_25, %c0_26] : memref<64x128xf32, #tpu.memory_space<vmem>>, vector<64x128xf32>
    tpu.vector_store %arg12[%c0_25, %c0_26], %34 {strides = array<i32>} : memref<64x128xf32, #tpu.memory_space<vmem>>, vector<64x128xf32>,
    %36 = arith.mulf %34, %34 : vector<64x128xf32>
    %cst_27 = arith.constant dense<0.000000e+00> : vector<64xf32>
    %37 = vector.multi_reduction <add>, %36, %cst_27 [1] : vector<64x128xf32> to vector<64xf32>
    %38 = vector.shape_cast %37 : vector<64xf32> to vector<64x1xf32>
    %cst_28 = arith.constant 1.000000e-24 : f32
    %39 = vector.broadcast %cst_28 : f32 to vector<64x1xf32>
    %40 = arith.maximumf %38, %39 : vector<64x1xf32>
    %41 = math.rsqrt %40 : vector<64x1xf32>
    %42 = vector.broadcast %41 : vector<64x1xf32> to vector<64x128xf32>
    %43 = arith.mulf %34, %42 : vector<64x128xf32>
    %c0_29 = arith.constant 0 : index
    %c0_30 = arith.constant 0 : index
    %44 = vector.load %arg10[%c0_29, %c0_30] : memref<128x128xf32, #tpu.memory_space<vmem>>, vector<128x128xf32>
    %cst_31 = arith.constant dense<0.000000e+00> : vector<64x128xf32>
    %45 = tpu.matmul %43, %44, %cst_31 {dimension_numbers = #tpu.dot_dimension_numbers<[1], [0], [0], [1], [0, 0, 1, 1], [], []>} : vector<64x128xf32>, vector<128x128xf32>, vector<64x128xf32> -> vector<64x128xf32>
    %46 = arith.mulf %45, %45 : vector<64x128xf32>
    %cst_32 = arith.constant 1.000000e+00 : f32
    %47 = vector.broadcast %cst_32 : f32 to vector<64x128xf32>
    %48 = arith.minimumf %46, %47 : vector<64x128xf32>
    %cst_33 = arith.constant 1.000000e+00 : f32
    %49 = vector.broadcast %cst_33 : f32 to vector<64x128xf32>
    %50 = arith.subf %49, %48 : vector<64x128xf32>
    %cst_34 = arith.constant 9.99999997E-7 : f32
    %51 = vector.broadcast %cst_34 : f32 to vector<64x128xf32>
    %52 = arith.addf %50, %51 : vector<64x128xf32>
    %53 = math.sqrt %52 : vector<64x128xf32>
    %cst_35 = arith.constant 0.87758255 : f32
    %54 = vector.broadcast %cst_35 : f32 to vector<64x128xf32>
    %55 = arith.mulf %45, %54 : vector<64x128xf32>
    %cst_36 = arith.constant 0.47942555 : f32
    %56 = vector.broadcast %cst_36 : f32 to vector<64x128xf32>
    %57 = arith.mulf %53, %56 : vector<64x128xf32>
    %58 = arith.subf %55, %57 : vector<64x128xf32>
    %cst_37 = arith.constant -0.87758255 : f32
    %59 = vector.broadcast %cst_37 : f32 to vector<64x128xf32>
    %60 = arith.subf %45, %59 : vector<64x128xf32>
    %cst_38 = arith.constant 0.000000e+00 : f32
    %61 = vector.broadcast %cst_38 : f32 to vector<64x128xf32>
    %62 = arith.cmpf ogt, %60, %61 : vector<64x128xf32>
    %cst_39 = arith.constant 0.239712775 : f32
    %63 = vector.broadcast %cst_39 : f32 to vector<64x128xf32>
    %64 = arith.subf %45, %63 : vector<64x128xf32>
    %65 = arith.select %62, %58, %64 : vector<64x128xi1>, vector<64x128xf32>
    %66 = tpu.iota {dimensions = array<i32: 1>} : vector<64x128xi32>
    %c0_40 = arith.constant 0 : index
    %c0_41 = arith.constant 0 : index
    %67 = vector.load %arg11[%c0_40, %c0_41] : memref<64x1xi32, #tpu.memory_space<vmem>>, vector<64x1xi32>
    %68 = vector.broadcast %67 : vector<64x1xi32> to vector<64x128xi32>
    %69 = arith.cmpi eq, %66, %68 : vector<64x128xi32>
    %70 = arith.extui %69 : vector<64x128xi1> to vector<64x128xi32>
    %71 = arith.sitofp %70 : vector<64x128xi32> to vector<64x128xf32>
    %72 = arith.mulf %71, %65 : vector<64x128xf32>
    %cst_42 = arith.constant 1.000000e+00 : f32
    %73 = vector.broadcast %cst_42 : f32 to vector<64x128xf32>
    %74 = arith.subf %73, %71 : vector<64x128xf32>
    %75 = arith.mulf %74, %45 : vector<64x128xf32>
    %76 = arith.addf %72, %75 : vector<64x128xf32>
    %cst_43 = arith.constant 3.200000e+01 : f32
    %77 = vector.broadcast %cst_43 : f32 to vector<64x128xf32>
    %78 = arith.mulf %76, %77 : vector<64x128xf32>
    %c0_44 = arith.constant 0 : index
    %c0_45 = arith.constant 0 : index
    %79 = vector.load %arg13[%c0_44, %c0_45] : memref<64x128xf32, #tpu.memory_space<vmem>>, vector<64x128xf32>
    tpu.vector_store %arg13[%c0_44, %c0_45], %78 {strides = array<i32>} : memref<64x128xf32, #tpu.memory_space<vmem>>, vector<64x128xf32>,
    return
  }
  func.func @transform_0(%arg0: i32) -> (i32, i32) {
    %c0_i32 = arith.constant 0 : i32
    %c0_i32_0 = arith.constant 0 : i32
    return %arg0, %c0_i32 : i32, i32
  }
  func.func @transform_1(%arg0: i32) -> (i32, i32) {
    %c0_i32 = arith.constant 0 : i32
    %c0_i32_0 = arith.constant 0 : i32
    %c0_i32_1 = arith.constant 0 : i32
    return %c0_i32, %c0_i32_0 : i32, i32
  }
  func.func @transform_2(%arg0: i32) -> (i32, i32) {
    %c0_i32 = arith.constant 0 : i32
    %c0_i32_0 = arith.constant 0 : i32
    %c0_i32_1 = arith.constant 0 : i32
    return %c0_i32, %c0_i32_0 : i32, i32
  }
  func.func @transform_3(%arg0: i32) -> (i32, i32) {
    %c0_i32 = arith.constant 0 : i32
    %c0_i32_0 = arith.constant 0 : i32
    %c0_i32_1 = arith.constant 0 : i32
    return %c0_i32, %c0_i32_0 : i32, i32
  }
  func.func @transform_4(%arg0: i32) -> (i32, i32) {
    %c0_i32 = arith.constant 0 : i32
    %c0_i32_0 = arith.constant 0 : i32
    %c0_i32_1 = arith.constant 0 : i32
    return %c0_i32, %c0_i32_0 : i32, i32
  }
  func.func @transform_5(%arg0: i32) -> (i32, i32) {
    %c0_i32 = arith.constant 0 : i32
    %c0_i32_0 = arith.constant 0 : i32
    %c0_i32_1 = arith.constant 0 : i32
    return %c0_i32, %c0_i32_0 : i32, i32
  }
  func.func @transform_6(%arg0: i32) -> (i32, i32) {
    %c0_i32 = arith.constant 0 : i32
    %c0_i32_0 = arith.constant 0 : i32
    %c0_i32_1 = arith.constant 0 : i32
    return %c0_i32, %c0_i32_0 : i32, i32
  }
  func.func @transform_7(%arg0: i32) -> (i32, i32) {
    %c0_i32 = arith.constant 0 : i32
    %c0_i32_0 = arith.constant 0 : i32
    %c0_i32_1 = arith.constant 0 : i32
    return %c0_i32, %c0_i32_0 : i32, i32
  }
  func.func @transform_8(%arg0: i32) -> (i32, i32) {
    %c0_i32 = arith.constant 0 : i32
    %c0_i32_0 = arith.constant 0 : i32
    %c0_i32_1 = arith.constant 0 : i32
    return %c0_i32, %c0_i32_0 : i32, i32
  }
  func.func @transform_9(%arg0: i32) -> (i32, i32) {
    %c0_i32 = arith.constant 0 : i32
    %c0_i32_0 = arith.constant 0 : i32
    %c0_i32_1 = arith.constant 0 : i32
    return %c0_i32, %c0_i32_0 : i32, i32
  }
  func.func @transform_10(%arg0: i32) -> (i32, i32) {
    %c0_i32 = arith.constant 0 : i32
    %c0_i32_0 = arith.constant 0 : i32
    return %arg0, %c0_i32 : i32, i32
  }
  func.func @transform_11(%arg0: i32) -> (i32, i32) {
    %c0_i32 = arith.constant 0 : i32
    %c0_i32_0 = arith.constant 0 : i32
    return %arg0, %c0_i32 : i32, i32
  }
  func.func @transform_12(%arg0: i32) -> (i32, i32) {
    %c0_i32 = arith.constant 0 : i32
    %c0_i32_0 = arith.constant 0 : i32
    return %arg0, %c0_i32 : i32, i32
  }
}

</mosaic_0001>

<bundles_post_ra>
// kernel: my_final_arcface_forward.1
= control target key start
LH: loop header
LB: loop body
LE: loop exit
PB: predicated region body
PF: predicated region fallthrough
CT: control target
= control target key end

     0   :  { %s2163_s21 = smov 0   ;;  %s2704_s0 = inlined_call_operand.vmem [shape: f32[128,17], index: 0, kind: input, shape index: {}]   ;;  %s2705_s1 = inlined_call_operand.vmem [shape: f32[17,64], index: 1, kind: input, shape index: {}]   ;;  %s2706_s2 = inlined_call_operand.vmem [shape: f32[1,64], index: 2, kind: input, shape index: {}]   ;;  %s2707_s3 = inlined_call_operand.vmem [shape: f32[64,64], index: 3, kind: input, shape index: {}]   ;;  %s2708_s4 = inlined_call_operand.vmem [shape: f32[1,64], index: 4, kind: input, shape index: {}]   ;;  %s2709_s5 = inlined_call_operand.vmem [shape: f32[64,64], index: 5, kind: input, shape index: {}]   ;;  %s2710_s6 = inlined_call_operand.vmem [shape: f32[1,64], index: 6, kind: input, shape index: {}]   ;;  %s2711_s7 = inlined_call_operand.vmem [shape: f32[64,128], index: 7, kind: input, shape index: {}]   ;;  %s2712_s8 = inlined_call_operand.vmem [shape: f32[1,128], index: 8, kind: input, shape index: {}]   ;;  %s2713_s9 = inlined_call_operand.vmem [shape: f32[128,128], index: 9, kind: input, shape index: {}]   ;;  %s2714_s10 = inlined_call_operand.vmem [shape: s32[128,1], index: 10, kind: input, shape index: {}]   ;;  %s2715_s11 = inlined_call_operand.vmem [shape: f32[128,128], index: 11, kind: output, shape index: {0}]   ;;  %s2716_s12 = inlined_call_operand.vmem [shape: f32[128,128], index: 12, kind: output, shape index: {1}]  }
   0x1 LB: > { %s1639_s22 = sadd.s32 4294967295, %s2094_s21   ;;  %p1643_p0 = scmp.ge.s32.totalorder %s2094_s21, 1  ;;  %s2094_s21 = sphi %s2163_s21, %s23_s21  }
   0x2   : > { %p377_p1 = scmp.lt.s32.totalorder %s2094_s21, 3 }
   0x4   : > { %p378_p2 = pnand %p1643_p0, %p377_p1 }
   0x5   : > { %v461_v0 = vld [vmem:[%s2705_s1] sm:$0xff] (!%p378_p2)  ;;  %v462_v1 = vld [vmem:[%s2705_s1 + $0x8] sm:$0xff] (!%p378_p2)  ;;  %s1644_s27 = sshll.u32 (!%p378_p2), %s1639_s22, 3  ;;  %v463_v3 = vld [vmem:[%s2705_s1 + $0x10] sm:$0x1] (!%p378_p2)  ;;  %vm496_vm0 = vcmask (!%p378_p2), 1040384  }
   0x6   : > { %381 = sbr.rel (%p378_p2) target bundleno = 1476 (0x5c4), region = 64  ;;  %v1944_v2 = vpack.c.bf16 (!%p378_p2), %v462_v1, %v461_v0  ;;  %p430_p3 = scmp.lt.s32.totalorder (!%p378_p2), %s1644_s27, 15  ;;  %v613_v4 = vld [vmem:[%s2707_s3] sm:$0xff] (!%p378_p2)  ;;  %v614_v5 = vld [vmem:[%s2707_s3 + $0x8] sm:$0xff] (!%p378_p2)  ;;  %v615_v6 = vld [vmem:[%s2707_s3 + $0x10] sm:$0xff] (!%p378_p2)  ;;  %vm471_vm1 = vcmask (!%p378_p2), 138240  }
   0x7   : > { %v616_v7 = vld [vmem:[%s2707_s3 + $0x18] sm:$0xff] (!%p378_p2)  ;;  %v1948_v8 = vpack.c.bf16 (!%p378_p2), %v614_v5, %v613_v4  ;;  %v617_v13 = vld [vmem:[%s2707_s3 + $0x20] sm:$0xff] (!%p378_p2)  ;;  %v618_v14 = vld [vmem:[%s2707_s3 + $0x28] sm:$0xff] (!%p378_p2)  ;;  %vm628_vm2 = vcmask (!%p378_p2), 523264  }
   0x8   : > { %1945 = vmatprep.subr.bf16.mxu1 (!%p378_p2), %v1944_v2  ;;  %v1952_v12 = vpack.c.bf16 (!%p378_p2), %v616_v7, %v615_v6  ;;  %v1956_v17 = vpack.c.bf16 (!%p378_p2), %v618_v14, %v617_v13  ;;  %v619_v21 = vld [vmem:[%s2707_s3 + $0x30] sm:$0xff] (!%p378_p2)  ;;  %v620_v22 = vld [vmem:[%s2707_s3 + $0x38] sm:$0xff] (!%p378_p2)  ;;  %v766_v24 = vld [vmem:[%s2709_s5] sm:$0xff] (!%p378_p2) }
   0x9   : > { %1947 = vmatpush3.bf16.msra.mxu1 (!%p378_p2), %v1944_v2  ;;  %v1960_v23 = vpack.c.bf16 (!%p378_p2), %v620_v22, %v619_v21  ;;  %v767_v25 = vld [vmem:[%s2709_s5 + $0x8] sm:$0xff] (!%p378_p2)  ;;  %v768_v26 = vld [vmem:[%s2709_s5 + $0x10] sm:$0xff] (!%p378_p2)  ;;  %v769_v28 = vld [vmem:[%s2709_s5 + $0x18] sm:$0xff] (!%p378_p2) }
   0xa   : > { %1802 = vmatprep.subr.msk.mxu1 (!%p378_p2), %vm496_vm0, %v463_v3  ;;  %v1964_v27 = vpack.c.bf16 (!%p378_p2), %v767_v25, %v766_v24  ;;  %v1968_v29 = vpack.c.bf16 (!%p378_p2), %v769_v28, %v768_v26  ;;  %v770_v30 = vld [vmem:[%s2709_s5 + $0x20] sm:$0xff] (!%p378_p2)  ;;  %v771_v31 = vld [vmem:[%s2709_s5 + $0x28] sm:$0xff] (!%p378_p2)  ;;  %v772_v58 = vld [vmem:[%s2709_s5 + $0x30] sm:$0xff] (!%p378_p2) }
   0xb   : > { %v1972_v32 = vpack.c.bf16 (!%p378_p2), %v771_v31, %v770_v30  ;;  %v1652_v33 = vld [vmem:[%s2706_s2] ss:$0 sm:$0xff] (!%p378_p2)  ;;  %v773_v59 = vld [vmem:[%s2709_s5 + $0x38] sm:$0xff] (!%p378_p2)  ;;  %v919_v62 = vld [vmem:[%s2711_s7 + $0x8] sm:$0xff] (!%p378_p2) }
   0xc   : > { %1965 = vmatprep.subr.bf16.mxu0 (!%p378_p2), %v1964_v27  ;;  %v1976_v60 = vpack.c.bf16 (!%p378_p2), %v773_v59, %v772_v58  ;;  %v918_v61 = vld [vmem:[%s2711_s7] sm:$0xff] (!%p378_p2)  ;;  %v920_v63 = vld [vmem:[%s2711_s7 + $0x10] sm:$0xff] (!%p378_p2)  ;;  %v921_v1 = vld [vmem:[%s2711_s7 + $0x18] sm:$0xff] (!%p378_p2) }
   0xd   : > { %s2718_s27 = smov (!%p430_p3, %s1644_s27), 15  ;;  %1803 = vmatpush3.msk.msra.mxu1 %vm496_vm0, %v463_v3  ;;  %1967 = vmatpush3.bf16.msra.mxu0 %v1964_v27  ;;  %v1980_v0 = vpack.c.bf16 %v919_v62, %v918_v61  ;;  %v1984_v2 = vpack.c.bf16 %v921_v1, %v920_v63  ;;  %v922_v3 = vld [vmem:[%s2711_s7 + $0x20] sm:$0xff]  ;;  %v923_v4 = vld [vmem:[%s2711_s7 + $0x28] sm:$0xff]  ;;  %v924_v31 = vld [vmem:[%s2711_s7 + $0x30] sm:$0xff] }
   0xe   : > { %s2193_s20 = sshll.u32 %s2718_s27, 3  ;;  %1949 = vmatprep.subr.bf16.mxu1 %v1948_v8  ;;  %1969 = vmatprep.subr.bf16.mxu0 %v1968_v29  ;;  %v1988_v5 = vpack.c.bf16 %v923_v4, %v922_v3  ;;  %v1662_v6 = vld [vmem:[%s2708_s4] ss:$0 sm:$0xff] }
   0xf   : > { %s433_s24 = scalar_lea.vmem %s2704_s0, %s2193_s20  ;;  %v1680_v59 = vld [vmem:[%s2712_s8] ss:$0 sm:$0xff]  ;;  %s2364_s27 = scalar_lea.vmem %s2715_s11, %s2193_s20 }
  0x10   : > { %v453_v9 = vld [vmem:[%s433_s24] sm:$0xff]  ;;  %v454_v10 = vld [vmem:[%s433_s24 + $0x8] sm:$0xff]  ;;  %v455_v11 = vld [vmem:[%s433_s24 + $0x10] sm:$0xff]  ;;  %s439_s30 = scalar_lea.vmem %s2714_s10, %s2193_s20  ;;  %s2632_s15 = scalar_lea.vmem %s2716_s12, %s2193_s20 }
  0x11   : > { %1804 = vmatprep.mubr.msk.f32.mxu1 %vm471_vm1, %v453_v9  ;;  %v456_v15 = vld [vmem:[%s433_s24 + $0x18] sm:$0xff]  ;;  %v457_v16 = vld [vmem:[%s433_s24 + $0x20] sm:$0xff]  ;;  %v458_v18 = vld [vmem:[%s433_s24 + $0x28] sm:$0xff]  ;;  %1971 = vmatpush3.bf16.msra.mxu0 %v1968_v29 }
  0x12   : > { %1805 = vmatmul.mubr.msk.f32.vlgmr.msra.gmra.mrb[0].mxu1 %vm471_vm1, %v454_v10  ;;  %v459_v19 = vld [vmem:[%s433_s24 + $0x30] sm:$0xff]  ;;  %v460_v20 = vld [vmem:[%s433_s24 + $0x38] sm:$0xff]  ;;  %1973 = vmatprep.subr.bf16.mxu0 %v1972_v32 }
  0x13   : > { %1807 = vmatprep.mubr.msk.f32.mxu1 %vm471_vm1, %v455_v11  ;;  %1951 = vmatpush3.bf16.msra.mxu1 %v1948_v8 }
  0x14   : > { %1953 = vmatprep.subr.bf16.mxu1 %v1952_v12 }
  0x15   : > { %1975 = vmatpush3.bf16.msra.mxu0 %v1972_v32  ;;  %v925_v32 = vld [vmem:[%s2711_s7 + $0x38] sm:$0xff] }
  0x16   : > { %1808 = vmatmul.mubr.msk.f32.gmra.mrb[2].mxu1 %vm471_vm1, %v456_v15  ;;  %1977 = vmatprep.subr.bf16.mxu0 %v1976_v60 }
  0x17   : > { %1810 = vmatprep.mubr.msk.f32.mxu1 %vm471_vm1, %v457_v16  ;;  %1955 = vmatpush3.bf16.msra.mxu1 %v1952_v12 }
  0x18   : > { %1957 = vmatprep.subr.bf16.mxu1 %v1956_v17 }
  0x19   : > { %1979 = vmatpush3.bf16.msra.mxu0 %v1976_v60 }
  0x1a   : > { %1811 = vmatmul.mubr.msk.f32.gmra.mrb[4].mxu1 %vm471_vm1, %v458_v18 }
  0x1b   : > { %1813 = vmatprep.mubr.msk.f32.mxu1 %vm471_vm1, %v459_v19  ;;  %1959 = vmatpush3.bf16.msra.mxu1 %v1956_v17 }
  0x1c   : > { %1961 = vmatprep.subr.bf16.mxu1 %v1960_v23 }
  0x1e   : > { %1814 = vmatmul.mubr.msk.f32.gmra.mrb[6].mxu1 %vm471_vm1, %v460_v20 }
  0x1f   : > { %1963 = vmatpush3.bf16.msra.mxu1 %v1960_v23 }
  0x20   : > { %1981 = vmatprep.subr.bf16.mxu1 %v1980_v0 }
  0xe5   : > { %v1806_v34 = vpop.f32.mrb[0].mxu1 }
  0xe6   : > { %v572_v35 = vadd.f32 %v1806_v34, %v1652_v33  ;;  %v566_v36 = vpop.f32.mrb[1].mxu1  ;;  %v1671_v34 = vld [vmem:[%s2710_s6] ss:$0 sm:$0xff] }
  0xe7   : > { %v567_v37 = vadd.f32 %v1652_v33, %v566_v36 }
  0xe8   : > { %v606_v40 = vmax.f32 %v572_v35, 0.0 }
  0xe9   : > { %v605_v38 = vmax.f32 %v567_v37, 0.0  ;;  %v1809_v39 = vpop.f32.mrb[2].mxu1 }
  0xea   : > { %v582_v41 = vadd.f32 %v1809_v39, %v1652_v33  ;;  %v576_v42 = vpop.f32.mrb[3].mxu1 }
  0xeb   : > { %v577_v43 = vadd.f32 %v1652_v33, %v576_v42  ;;  %1832 = vmatprep.mubr.msk.f32.mxu1 %vm628_vm2, %v605_v38 }
  0xec   : > { %1833 = vmatmul.mubr.msk.f32.vlgmr.msra.gmra.mrb[8].mxu1 %vm628_vm2, %v606_v40  ;;  %v608_v46 = vmax.f32 %v582_v41, 0.0 }
  0xed   : > { %v607_v44 = vmax.f32 %v577_v43, 0.0  ;;  %v1812_v45 = vpop.f32.mrb[4].mxu1  ;;  %1983 = vmatpush3.bf16.msra.mxu1 %v1980_v0 }
  0xee   : > { %v592_v47 = vadd.f32 %v1812_v45, %v1652_v33  ;;  %v586_v48 = vpop.f32.mrb[5].mxu1  ;;  %1985 = vmatprep.subr.bf16.mxu1 %v1984_v2 }
  0xef   : > { %v587_v49 = vadd.f32 %v1652_v33, %v586_v48  ;;  %1835 = vmatprep.mubr.msk.f32.mxu1 %vm628_vm2, %v607_v44 }
  0xf0   : > { %v610_v50 = vmax.f32 %v592_v47, 0.0  ;;  %1836 = vmatmul.mubr.msk.f32.gmra.mrb[10].mxu1 %vm628_vm2, %v608_v46 }
  0xf1   : > { %v609_v51 = vmax.f32 %v587_v49, 0.0  ;;  %v1815_v52 = vpop.f32.mrb[6].mxu1  ;;  %1987 = vmatpush3.bf16.msra.mxu1 %v1984_v2 }
  0xf2   : > { %v602_v53 = vadd.f32 %v1815_v52, %v1652_v33  ;;  %v596_v54 = vpop.f32.mrb[7].mxu1  ;;  %1989 = vmatprep.subr.bf16.mxu1 %v1988_v5 }
  0xf3   : > { %v597_v55 = vadd.f32 %v1652_v33, %v596_v54  ;;  %1838 = vmatprep.mubr.msk.f32.mxu1 %vm628_vm2, %v609_v51  ;;  %v1992_v33 = vpack.c.bf16 %v925_v32, %v924_v31 }
  0xf4   : > { %v612_v56 = vmax.f32 %v602_v53, 0.0  ;;  %1839 = vmatmul.mubr.msk.f32.gmra.mrb[12].mxu1 %vm628_vm2, %v610_v50 }
  0xf5   : > { %v611_v57 = vmax.f32 %v597_v55, 0.0  ;;  %1991 = vmatpush3.bf16.msra.mxu1 %v1988_v5 }
  0xf6   : > { %1993 = vmatprep.subr.bf16.mxu1 %v1992_v33 }
  0xf7   : > { %1841 = vmatprep.mubr.msk.f32.mxu1 %vm628_vm2, %v611_v57 }
  0xf8   : > { %1842 = vmatmul.mubr.msk.f32.gmra.mrb[14].mxu1 %vm628_vm2, %v612_v56 }
  0xf9   : > { %1995 = vmatpush3.bf16.msra.mxu1 %v1992_v33 }
 0x1bf   : > { %v1834_v7 = vpop.f32.mrb[8].mxu1 }
 0x1c0   : > { %v725_v8 = vadd.f32 %v1834_v7, %v1662_v6  ;;  %v719_v9 = vpop.f32.mrb[9].mxu1 }
 0x1c1   : > { %v720_v10 = vadd.f32 %v1662_v6, %v719_v9 }
 0x1c2   : > { %v759_v13 = vmax.f32 %v725_v8, 0.0 }
 0x1c3   : > { %v758_v11 = vmax.f32 %v720_v10, 0.0  ;;  %v1837_v12 = vpop.f32.mrb[10].mxu1 }
 0x1c4   : > { %v735_v14 = vadd.f32 %v1837_v12, %v1662_v6  ;;  %v729_v15 = vpop.f32.mrb[11].mxu1 }
 0x1c5   : > { %v730_v16 = vadd.f32 %v1662_v6, %v729_v15  ;;  %1860 = vmatprep.mubr.msk.f32.mxu0 %vm628_vm2, %v758_v11 }
 0x1c6   : > { %1861 = vmatmul.mubr.msk.f32.vlgmr.msra.gmra.mrb[0].mxu0 %vm628_vm2, %v759_v13  ;;  %v761_v19 = vmax.f32 %v735_v14, 0.0 }
 0x1c7   : > { %v760_v17 = vmax.f32 %v730_v16, 0.0  ;;  %v1840_v18 = vpop.f32.mrb[12].mxu1 }
 0x1c8   : > { %v745_v20 = vadd.f32 %v1840_v18, %v1662_v6  ;;  %v739_v21 = vpop.f32.mrb[13].mxu1 }
 0x1c9   : > { %v740_v22 = vadd.f32 %v1662_v6, %v739_v21  ;;  %1863 = vmatprep.mubr.msk.f32.mxu0 %vm628_vm2, %v760_v17  ;;  %v1167_v21 = vld [vmem:[%s2713_s9 + $0x8] sm:$0xff] }
 0x1ca   : > { %v763_v23 = vmax.f32 %v745_v20, 0.0  ;;  %1864 = vmatmul.mubr.msk.f32.gmra.mrb[2].mxu0 %vm628_vm2, %v761_v19  ;;  %v1166_v20 = vld [vmem:[%s2713_s9] sm:$0xff] }
 0x1cb   : > { %v762_v24 = vmax.f32 %v740_v22, 0.0  ;;  %v1843_v25 = vpop.f32.mrb[14].mxu1  ;;  %v1168_v22 = vld [vmem:[%s2713_s9 + $0x10] sm:$0xff] }
 0x1cc   : > { %v755_v26 = vadd.f32 %v1843_v25, %v1662_v6  ;;  %v749_v27 = vpop.f32.mrb[15].mxu1 }
 0x1cd   : > { %v750_v28 = vadd.f32 %v1662_v6, %v749_v27  ;;  %1866 = vmatprep.mubr.msk.f32.mxu0 %vm628_vm2, %v762_v24  ;;  %v1169_v24 = vld [vmem:[%s2713_s9 + $0x18] sm:$0xff]  ;;  %v1171_v27 = vld [vmem:[%s2713_s9 + $0x28] sm:$0xff] }
 0x1ce   : > { %v765_v29 = vmax.f32 %v755_v26, 0.0  ;;  %1867 = vmatmul.mubr.msk.f32.gmra.mrb[4].mxu0 %vm628_vm2, %v763_v23  ;;  %v1996_v23 = vpack.c.bf16 %v1167_v21, %v1166_v20  ;;  %v2000_v25 = vpack.c.bf16 %v1169_v24, %v1168_v22  ;;  %v1170_v26 = vld [vmem:[%s2713_s9 + $0x20] sm:$0xff]  ;;  %v2096_v20 = vmov 0   ;;  %v1434_v21 = vld [vmem:[%s439_s30 + $0x8] sm:$0xff]  ;;  %v1436_v24 = vld [vmem:[%s439_s30 + $0x18] sm:$0xff] }
 0x1cf   : > { %v764_v30 = vmax.f32 %v750_v28, 0.0  ;;  %v2004_v28 = vpack.c.bf16 %v1171_v27, %v1170_v26  ;;  %2039 = vset.pattern.permute.xlu1 %v2096_v20  ;;  %2038 = vset.pattern.permute.xlu0 %v2096_v20  ;;  %v1433_v22 = vld [vmem:[%s439_s30] sm:$0xff]  ;;  %v1438_v26 = vld [vmem:[%s439_s30 + $0x28] sm:$0xff]  ;;  %v1439_v27 = vld [vmem:[%s439_s30 + $0x30] sm:$0xff] }
 0x1d0   : > { %1997 = vmatprep.subr.bf16.mxu0 %v1996_v23 }
 0x1d1   : > { %1869 = vmatprep.mubr.msk.f32.mxu0 %vm628_vm2, %v764_v30  ;;  %1999 = vmatpush3.bf16.msra.mxu0 %v1996_v23  ;;  %v1173_v30 = vld [vmem:[%s2713_s9 + $0x38] sm:$0xff]  ;;  %v1435_v23 = vld [vmem:[%s439_s30 + $0x10] sm:$0xff] }
 0x1d2   : > { %1870 = vmatmul.mubr.msk.f32.gmra.mrb[6].mxu0 %vm628_vm2, %v765_v29  ;;  %2001 = vmatprep.subr.bf16.mxu0 %v2000_v25  ;;  %v1172_v29 = vld [vmem:[%s2713_s9 + $0x30] sm:$0xff] }
 0x1d3   : > { %v2008_v31 = vpack.c.bf16 %v1173_v30, %v1172_v29 }
 0x1d5   : > { %2003 = vmatpush3.bf16.msra.mxu0 %v2000_v25  ;;  %v1437_v25 = vld [vmem:[%s439_s30 + $0x20] sm:$0xff] }
 0x1d6   : > { %2005 = vmatprep.subr.bf16.mxu0 %v2004_v28 }
 0x1d9   : > { %2007 = vmatpush3.bf16.msra.mxu0 %v2004_v28  ;;  %v1440_v28 = vld [vmem:[%s439_s30 + $0x38] sm:$0xff] }
 0x1da   : > { %2009 = vmatprep.subr.bf16.mxu0 %v2008_v31 }
 0x1dd   : > { %2011 = vmatpush3.bf16.msra.mxu0 %v2008_v31 }
 0x299   : > { %v1862_v35 = vpop.f32.mrb[0].mxu0 }
 0x29a   : > { %v877_v36 = vadd.f32 %v1862_v35, %v1671_v34  ;;  %v871_v37 = vpop.f32.mrb[1].mxu0 }
 0x29b   : > { %v872_v38 = vadd.f32 %v1671_v34, %v871_v37 }
 0x29c   : > { %v911_v41 = vmax.f32 %v877_v36, 0.0 }
 0x29d   : > { %v910_v39 = vmax.f32 %v872_v38, 0.0  ;;  %v1865_v40 = vpop.f32.mrb[2].mxu0 }
 0x29e   : > { %v887_v42 = vadd.f32 %v1865_v40, %v1671_v34  ;;  %v881_v43 = vpop.f32.mrb[3].mxu0 }
 0x29f   : > { %v882_v44 = vadd.f32 %v1671_v34, %v881_v43  ;;  %1888 = vmatprep.mubr.msk.f32.mxu1 %vm628_vm2, %v910_v39 }
 0x2a0   : > { %1889 = vmatmul.mubr.msk.f32.vlgmr.msra.gmra.mrb[16].mxu1 %vm628_vm2, %v911_v41  ;;  %v913_v47 = vmax.f32 %v887_v42, 0.0 }
 0x2a1   : > { %v912_v45 = vmax.f32 %v882_v44, 0.0  ;;  %v1868_v46 = vpop.f32.mrb[4].mxu0 }
 0x2a2   : > { %v897_v48 = vadd.f32 %v1868_v46, %v1671_v34  ;;  %v891_v49 = vpop.f32.mrb[5].mxu0 }
 0x2a3   : > { %v892_v50 = vadd.f32 %v1671_v34, %v891_v49  ;;  %1891 = vmatprep.mubr.msk.f32.mxu1 %vm628_vm2, %v912_v45 }
 0x2a4   : > { %1892 = vmatmul.mubr.msk.f32.gmra.mrb[18].mxu1 %vm628_vm2, %v913_v47  ;;  %v915_v53 = vmax.f32 %v897_v48, 0.0 }
 0x2a5   : > { %v914_v51 = vmax.f32 %v892_v50, 0.0  ;;  %v1871_v52 = vpop.f32.mrb[6].mxu0 }
 0x2a6   : > { %v907_v54 = vadd.f32 %v1871_v52, %v1671_v34  ;;  %v901_v55 = vpop.f32.mrb[7].mxu0 }
 0x2a7   : > { %v902_v56 = vadd.f32 %v1671_v34, %v901_v55  ;;  %1894 = vmatprep.mubr.msk.f32.mxu1 %vm628_vm2, %v914_v51 }
 0x2a8   : > { %1895 = vmatmul.mubr.msk.f32.gmra.mrb[20].mxu1 %vm628_vm2, %v915_v53  ;;  %v917_v58 = vmax.f32 %v907_v54, 0.0 }
 0x2a9   : > { %v916_v57 = vmax.f32 %v902_v56, 0.0 }
 0x2ab   : > { %1897 = vmatprep.mubr.msk.f32.mxu1 %vm628_vm2, %v916_v57 }
 0x2ac   : > { %1898 = vmatmul.mubr.msk.f32.gmra.mrb[22].mxu1 %vm628_vm2, %v917_v58 }
 0x373   : > { %v1890_v60 = vpop.f32.mrb[16].mxu1 }
 0x374   : > { %v1023_v61 = vpop.f32.mrb[17].mxu1  ;;  %v2306_v63 = vadd.f32 %v1890_v60, %v1680_v59 }
 0x375   : > { %v2304_v62 = vadd.f32 %v1680_v59, %v1023_v61 }
 0x376   : > { %v1063_v7 = vmul.f32 %v2306_v63, %v2306_v63 }
 0x377   : > { %v1893_v0 = vpop.f32.mrb[18].mxu1  ;;  %v1062_v1 = vmul.f32 %v2304_v62, %v2304_v62 }
 0x378   : > { %v1033_v2 = vpop.f32.mrb[19].mxu1  ;;  %v2312_v4 = vadd.f32 %v1893_v0, %v1680_v59 }
 0x379   : > { %v2310_v3 = vadd.f32 %v1680_v59, %v1033_v2  ;;  %1070 = vadd.xlane.f32.xlu0 %v1062_v1 }
 0x37a   : > { %v1065_v12 = vmul.f32 %v2312_v4, %v2312_v4 }
 0x37b   : > { %v1896_v5 = vpop.f32.mrb[20].mxu1  ;;  %v1064_v6 = vmul.f32 %v2310_v3, %v2310_v3 }
 0x37c   : > { %v1043_v8 = vpop.f32.mrb[21].mxu1  ;;  %v2320_v10 = vadd.f32 %v1896_v5, %v1680_v59 }
 0x37d   : > { %v2318_v9 = vadd.f32 %v1680_v59, %v1043_v8  ;;  %1074 = vadd.xlane.f32.xlu1 %v1064_v6  ;;  %1072 = vadd.xlane.f32.xlu0 %v1063_v7  ;;  %v1174_v8 = vld [vmem:[%s2713_s9 + $0x40] sm:$0xff] }
 0x37e   : > { %v1067_v17 = vmul.f32 %v2320_v10, %v2320_v10 }
 0x37f   : > { %v1899_v11 = vpop.f32.mrb[22].mxu1  ;;  %v1066_v13 = vmul.f32 %v2318_v9, %v2318_v9 }
 0x380   : > { %v1053_v14 = vpop.f32.mrb[23].mxu1  ;;  %v2328_v16 = vadd.f32 %v1899_v11, %v1680_v59  ;;  %v1176_v11 = vld [vmem:[%s2713_s9 + $0x50] sm:$0xff] }
 0x381   : > { %v2326_v15 = vadd.f32 %v1680_v59, %v1053_v14  ;;  %1076 = vadd.xlane.f32.xlu1 %v1065_v12  ;;  %1078 = vadd.xlane.f32.xlu0 %v1066_v13  ;;  %v1177_v12 = vld [vmem:[%s2713_s9 + $0x58] sm:$0xff]  ;;  %v1178_v14 = vld [vmem:[%s2713_s9 + $0x60] sm:$0xff] }
 0x382   : > { %v1069_v19 = vmul.f32 %v2328_v16, %v2328_v16  ;;  %v2016_v13 = vpack.c.bf16 %v1177_v12, %v1176_v11  ;;  %v2097_v11 = vmov 0.0  }
 0x383   : > { %v1068_v18 = vmul.f32 %v2326_v15, %v2326_v15 }
 0x385   : > { %1080 = vadd.xlane.f32.xlu1 %v1067_v17  ;;  %1082 = vadd.xlane.f32.xlu0 %v1068_v18  ;;  %v1180_v17 = vld [vmem:[%s2713_s9 + $0x70] sm:$0xff]  ;;  %v1181_v18 = vld [vmem:[%s2713_s9 + $0x78] sm:$0xff] }
 0x389   : > { %1084 = vadd.xlane.f32.xlu1 %v1069_v19  ;;  %v2024_v19 = vpack.c.bf16 %v1181_v18, %v1180_v17 }
 0x406   : > { %v1071_v32 = vpop.xlane.xlu0 %1070 }
 0x407   : > { %v1086_v33 = vmax.f32 %v1071_v32, 1e-24 }
 0x409   : > { %2040 = vrsqrt.f32 %v1086_v33 }
 0x40a   : > { %v1075_v34 = vpop.xlane.xlu1 %1074  ;;  %v1073_v35 = vpop.xlane.xlu0 %1072 }
 0x40b   : > { %v1088_v36 = vmax.f32 %v1075_v34, 1e-24  ;;  %v1087_v37 = vmax.f32 %v1073_v35, 1e-24 }
 0x40d   : > { %2042 = vrsqrt.f32 %v1088_v36 }
 0x40e   : > { %2044 = vrsqrt.f32 %v1087_v37  ;;  %v1077_v38 = vpop.xlane.xlu1 %1076  ;;  %v1079_v39 = vpop.xlane.xlu0 %1078 }
 0x40f   : > { %v1089_v40 = vmax.f32 %v1077_v38, 1e-24  ;;  %v1090_v41 = vmax.f32 %v1079_v39, 1e-24 }
 0x411   : > { %2046 = vrsqrt.f32 %v1089_v40 }
 0x412   : > { %2048 = vrsqrt.f32 %v1090_v41  ;;  %v1081_v42 = vpop.xlane.xlu1 %1080  ;;  %v1083_v43 = vpop.xlane.xlu0 %1082 }
 0x413   : > { %v2041_v44 = vpop.eup %2040  ;;  %v1091_v45 = vmax.f32 %v1081_v42, 1e-24  ;;  %v1092_v46 = vmax.f32 %v1083_v43, 1e-24 }
 0x414   : > { %v2367_v47 = vmul.f32 %v2041_v44, %v2304_v62 }
 0x415   : > { %2050 = vrsqrt.f32 %v1091_v45 }
 0x416   : > { %2052 = vrsqrt.f32 %v1092_v46  ;;  %v1085_v48 = vpop.xlane.xlu1 %1084  ;;  %v1118_v49 = vmul.f32 %v2367_v47, %v2367_v47  ;;  %1110 = vst [vmem:[%s2364_s27] sm:$0xff] %v2367_v47 }
 0x417   : > { %v2043_v50 = vpop.eup %2042  ;;  %v1093_v51 = vmax.f32 %v1085_v48, 1e-24 }
 0x418   : > { %v2045_v52 = vpop.eup %2044  ;;  %1126 = vadd.xlane.f32.xlu0 %v1118_v49  ;;  %v2374_v53 = vmul.f32 %v2043_v50, %v2310_v3 }
 0x419   : > { %2054 = vrsqrt.f32 %v1093_v51  ;;  %v2377_v54 = vmul.f32 %v2045_v52, %v2306_v63 }
 0x41a   : > { %1112 = vst [vmem:[%s2364_s27 + $0x10] sm:$0xff] %v2374_v53  ;;  %v1120_v55 = vmul.f32 %v2374_v53, %v2374_v53 }
 0x41b   : > { %v2047_v56 = vpop.eup %2046  ;;  %v1119_v57 = vmul.f32 %v2377_v54, %v2377_v54  ;;  %1111 = vst [vmem:[%s2364_s27 + $0x8] sm:$0xff] %v2377_v54 }
 0x41c   : > { %v2049_v58 = vpop.eup %2048  ;;  %1130 = vadd.xlane.f32.xlu0 %v1120_v55  ;;  %v2388_v59 = vmul.f32 %v2047_v56, %v2312_v4 }
 0x41d   : > { %1128 = vadd.xlane.f32.xlu1 %v1119_v57  ;;  %v2391_v60 = vmul.f32 %v2049_v58, %v2318_v9  ;;  %v1175_v9 = vld [vmem:[%s2713_s9 + $0x48] sm:$0xff] }
 0x41e   : > { %1113 = vst [vmem:[%s2364_s27 + $0x18] sm:$0xff] %v2388_v59  ;;  %v1121_v61 = vmul.f32 %v2388_v59, %v2388_v59 }
 0x41f   : > { %v2051_v62 = vpop.eup %2050  ;;  %v1122_v63 = vmul.f32 %v2391_v60, %v2391_v60  ;;  %1114 = vst [vmem:[%s2364_s27 + $0x20] sm:$0xff] %v2391_v60 }
 0x420   : > { %v2053_v0 = vpop.eup %2052  ;;  %v2402_v1 = vmul.f32 %v2051_v62, %v2320_v10  ;;  %v2012_v10 = vpack.c.bf16 %v1175_v9, %v1174_v8 }
 0x421   : > { %1132 = vadd.xlane.f32.xlu1 %v1121_v61  ;;  %1134 = vadd.xlane.f32.xlu0 %v1122_v63  ;;  %v2405_v2 = vmul.f32 %v2053_v0, %v2326_v15  ;;  %v1179_v15 = vld [vmem:[%s2713_s9 + $0x68] sm:$0xff] }
 0x422   : > { %1115 = vst [vmem:[%s2364_s27 + $0x28] sm:$0xff] %v2402_v1  ;;  %v1123_v3 = vmul.f32 %v2402_v1, %v2402_v1  ;;  %2013 = vmatprep.subr.bf16.mxu0 %v2012_v10 }
 0x423   : > { %v2055_v4 = vpop.eup %2054  ;;  %v1124_v5 = vmul.f32 %v2405_v2, %v2405_v2  ;;  %1116 = vst [vmem:[%s2364_s27 + $0x30] sm:$0xff] %v2405_v2  ;;  %2015 = vmatpush3.bf16.msra.mxu0 %v2012_v10 }
 0x424   : > { %v2416_v6 = vmul.f32 %v2055_v4, %v2328_v16  ;;  %2017 = vmatprep.subr.bf16.mxu0 %v2016_v13  ;;  %v2020_v16 = vpack.c.bf16 %v1179_v15, %v1178_v14  ;;  %v1431_v4 = vlaneseq }
 0x425   : > { %1136 = vadd.xlane.f32.xlu1 %v1123_v3  ;;  %1138 = vadd.xlane.f32.xlu0 %v1124_v5 }
 0x426   : > { %1117 = vst [vmem:[%s2364_s27 + $0x38] sm:$0xff] %v2416_v6  ;;  %v1125_v7 = vmul.f32 %v2416_v6, %v2416_v6  ;;  %v1432_v5 = vand.u32 127, %v1431_v4 }
 0x427   : > { %2019 = vmatpush3.bf16.msra.mxu0 %v2016_v13 }
 0x428   : > { %2021 = vmatprep.subr.bf16.mxu0 %v2020_v16 }
 0x429   : > { %1140 = vadd.xlane.f32.xlu1 %v1125_v7 }
 0x42b   : > { %2023 = vmatpush3.bf16.msra.mxu0 %v2020_v16 }
 0x42c   : > { %2025 = vmatprep.subr.bf16.mxu0 %v2024_v19 }
 0x42f   : > { %2027 = vmatpush3.bf16.msra.mxu0 %v2024_v19 }
 0x43a   : > { %1445 = vperm.xlu1 %2039, %v1434_v21  }
 0x43b   : > { %1442 = vperm.xlu0 %2038, %v1433_v22  }
 0x43e   : > { %1448 = vperm.xlu1 %2039, %v1435_v23  }
 0x442   : > { %1451 = vperm.xlu1 %2039, %v1436_v24  }
 0x446   : > { %1454 = vperm.xlu1 %2039, %v1437_v25  }
 0x44a   : > { %1457 = vperm.xlu1 %2039, %v1438_v26  }
 0x44e   : > { %1460 = vperm.xlu1 %2039, %v1439_v27  }
 0x452   : > { %1463 = vperm.xlu1 %2039, %v1440_v28  }
 0x4a5   : > { %v1127_v29 = vpop.xlane.xlu0 %1126 }
 0x4a6   : > { %v1142_v30 = vmax.f32 %v1127_v29, 1e-24 }
 0x4a8   : > { %2056 = vrsqrt.f32 %v1142_v30 }
 0x4a9   : > { %v1131_v31 = vpop.xlane.xlu0 %1130 }
 0x4aa   : > { %v1129_v32 = vpop.xlane.xlu1 %1128  ;;  %v1144_v33 = vmax.f32 %v1131_v31, 1e-24 }
 0x4ab   : > { %v1143_v34 = vmax.f32 %v1129_v32, 1e-24 }
 0x4ac   : > { %2058 = vrsqrt.f32 %v1144_v33 }
 0x4ad   : > { %2060 = vrsqrt.f32 %v1143_v34 }
 0x4ae   : > { %v1133_v35 = vpop.xlane.xlu1 %1132  ;;  %v1135_v36 = vpop.xlane.xlu0 %1134 }
 0x4af   : > { %v1145_v37 = vmax.f32 %v1133_v35, 1e-24  ;;  %v1146_v38 = vmax.f32 %v1135_v36, 1e-24 }
 0x4b1   : > { %2062 = vrsqrt.f32 %v1145_v37 }
 0x4b2   : > { %v2057_v39 = vpop.eup %2056  ;;  %2064 = vrsqrt.f32 %v1146_v38  ;;  %v1137_v40 = vpop.xlane.xlu1 %1136 }
 0x4b3   : > { %v1139_v41 = vpop.xlane.xlu0 %1138  ;;  %v1147_v42 = vmax.f32 %v1137_v40, 1e-24  ;;  %v1158_v44 = vmul.f32 %v2057_v39, %v2367_v47 }
 0x4b4   : > { %v1148_v43 = vmax.f32 %v1139_v41, 1e-24 }
 0x4b5   : > { %2066 = vrsqrt.f32 %v1147_v42  ;;  %1932 = vmatprep.mubr.f32.mxu0 %v1158_v44 }
 0x4b6   : > { %v2059_v45 = vpop.eup %2058  ;;  %2068 = vrsqrt.f32 %v1148_v43  ;;  %v1141_v46 = vpop.xlane.xlu1 %1140 }
 0x4b7   : > { %v2061_v48 = vpop.eup %2060  ;;  %v1149_v49 = vmax.f32 %v1141_v46, 1e-24  ;;  %v1160_v50 = vmul.f32 %v2059_v45, %v2374_v53 }
 0x4b8   : > { %v1159_v51 = vmul.f32 %v2061_v48, %v2377_v54 }
 0x4b9   : > { %2070 = vrsqrt.f32 %v1149_v49 }
 0x4ba   : > { %1933 = vmatmul.mubr.f32.vlgmr.msra.gmra.mrb[8].mxu0 %v1159_v51  ;;  %v1446_v63 = vpop.permute.xlu1 %1445  ;;  %v1443_v7 = vpop.permute.xlu0 %1442 }
 0x4bb   : > { %v2063_v52 = vpop.eup %2062  ;;  %1935 = vmatprep.mubr.f32.mxu0 %v1160_v50  ;;  %vm1466_vm3 = vcmp.eq.s32.totalorder %v1432_v5, %v1446_v63  ;;  %vm1465_vm4 = vcmp.eq.s32.totalorder %v1432_v5, %v1443_v7 }
 0x4bc   : > { %v2065_v55 = vpop.eup %2064  ;;  %v1161_v56 = vmul.f32 %v2063_v52, %v2388_v59  ;;  %v2458_v12 = vsel %vm1466_vm3, 1.0, %v2097_v11  ;;  %v2460_v13 = vsel %vm1465_vm4, 1.0, %v2097_v11 }
 0x4bd   : > { %v1162_v47 = vmul.f32 %v2065_v55, %v2391_v60  ;;  %v1498_v27 = vsub.f32 1.0, %v2458_v12  ;;  %v1497_v28 = vsub.f32 1.0, %v2460_v13 }
 0x4be   : > { %1936 = vmatmul.mubr.f32.gmra.mrb[10].mxu0 %v1161_v56  ;;  %v1449_v0 = vpop.permute.xlu1 %1448 }
 0x4bf   : > { %v2067_v57 = vpop.eup %2066  ;;  %1938 = vmatprep.mubr.f32.mxu0 %v1162_v47  ;;  %vm1467_vm5 = vcmp.eq.s32.totalorder %v1432_v5, %v1449_v0 }
 0x4c0   : > { %v2069_v58 = vpop.eup %2068  ;;  %v1163_v61 = vmul.f32 %v2067_v57, %v2402_v1  ;;  %v2464_v19 = vsel %vm1467_vm5, 1.0, %v2097_v11 }
 0x4c1   : > { %v1164_v62 = vmul.f32 %v2069_v58, %v2405_v2  ;;  %v1499_v31 = vsub.f32 1.0, %v2464_v19 }
 0x4c2   : > { %1939 = vmatmul.mubr.f32.gmra.mrb[12].mxu0 %v1163_v61  ;;  %v1452_v3 = vpop.permute.xlu1 %1451 }
 0x4c3   : > { %v2071_v53 = vpop.eup %2070  ;;  %1941 = vmatprep.mubr.f32.mxu0 %v1164_v62  ;;  %vm1468_vm6 = vcmp.eq.s32.totalorder %v1432_v5, %v1452_v3 }
 0x4c4   : > { %v1165_v54 = vmul.f32 %v2071_v53, %v2416_v6  ;;  %v2466_v20 = vsel %vm1468_vm6, 1.0, %v2097_v11 }
 0x4c5   : > { %v1500_v32 = vsub.f32 1.0, %v2466_v20 }
 0x4c6   : > { %1942 = vmatmul.mubr.f32.gmra.mrb[14].mxu0 %v1165_v54  ;;  %v1455_v59 = vpop.permute.xlu1 %1454 }
 0x4c7   : > { %vm1469_vm7 = vcmp.eq.s32.totalorder %v1432_v5, %v1455_v59 }
 0x4c8   : > { %v2468_v21 = vsel %vm1469_vm7, 1.0, %v2097_v11 }
 0x4c9   : > { %v1501_v34 = vsub.f32 1.0, %v2468_v21 }
 0x4ca   : > { %v1458_v60 = vpop.permute.xlu1 %1457 }
 0x4cb   : > { %vm1470_vm8 = vcmp.eq.s32.totalorder %v1432_v5, %v1458_v60 }
 0x4cc   : > { %v2476_v29 = vsel %vm1470_vm8, 1.0, %v2097_v11 }
 0x4cd   : > { %v1502_v38 = vsub.f32 1.0, %v2476_v29 }
 0x4ce   : > { %v1461_v9 = vpop.permute.xlu1 %1460 }
 0x4cf   : > { %vm1471_vm9 = vcmp.eq.s32.totalorder %v1432_v5, %v1461_v9 }
 0x4d0   : > { %v2491_v40 = vsel %vm1471_vm9, 1.0, %v2097_v11 }
 0x4d2   : > { %v1464_v22 = vpop.permute.xlu1 %1463 }
 0x4d3   : > { %vm1472_vm10 = vcmp.eq.s32.totalorder %v1432_v5, %v1464_v22 }
 0x4d4   : > { %v2500_v44 = vsel %vm1472_vm10, 1.0, %v2097_v11 }
 0x58d   : > { %v1934_v8 = vpop.f32.mrb[8].mxu0 }
 0x58e   : > { %v1288_v1 = vmul.f32 %v1934_v8, %v1934_v8  ;;  %v1248_v2 = vpop.f32.mrb[9].mxu0  ;;  %v2489_v39 = vmul.f32 0.87758255, %v1934_v8  ;;  %v2495_v42 = vadd.f32 0.87758255, %v1934_v8  ;;  %v2504_v46 = vmul.f32 %v1934_v8, %v1498_v27 }
 0x58f   : > { %v1287_v6 = vmul.f32 %v1248_v2, %v1248_v2  ;;  %v2497_v43 = vadd.f32 -0.23971277, %v1934_v8  ;;  %v2510_v52 = vmul.f32 0.87758255, %v1248_v2  ;;  %v2512_v55 = vadd.f32 0.87758255, %v1248_v2 }
 0x590   : > { %v1296_v10 = vmin.f32 %v1288_v1, 1.0  ;;  %v2514_v56 = vadd.f32 -0.23971277, %v1248_v2  ;;  %v2518_v57 = vmul.f32 %v1497_v28, %v1248_v2  ;;  %vm1408_vm13 = vcmp.gt.f32.partialorder %v2495_v42, 0.0 }
 0x591   : > { %v1937_v14 = vpop.f32.mrb[10].mxu0  ;;  %v1295_v16 = vmin.f32 %v1287_v6, 1.0  ;;  %vm1407_vm0 = vcmp.gt.f32.partialorder %v2512_v55, 0.0 }
 0x592   : > { %v1304_v15 = vsub.f32 1.0, %v1296_v10  ;;  %v1290_v17 = vmul.f32 %v1937_v14, %v1937_v14  ;;  %v2462_v18 = vpop.f32.mrb[11].mxu0  ;;  %v2521_v58 = vmul.f32 0.87758255, %v1937_v14  ;;  %v2523_v61 = vadd.f32 0.87758255, %v1937_v14 }
 0x593   : > { %v1303_v24 = vsub.f32 1.0, %v1295_v16  ;;  %v1289_v26 = vmul.f32 %v2462_v18, %v2462_v18  ;;  %v2525_v62 = vadd.f32 -0.23971277, %v1937_v14  ;;  %v2529_v0 = vmul.f32 %v1937_v14, %v1500_v32 }
 0x594   : > { %v2470_v23 = vadd.f32 1e-06, %v1304_v15  ;;  %v1298_v25 = vmin.f32 %v1290_v17, 1.0  ;;  %v2532_v3 = vmul.f32 0.87758255, %v2462_v18  ;;  %v2543_v60 = vmul.f32 %v1499_v31, %v2462_v18 }
 0x595   : > { %v2478_v30 = vpop.f32.mrb[12].mxu0  ;;  %v2486_v35 = vadd.f32 1e-06, %v1303_v24  ;;  %v1297_v37 = vmin.f32 %v1289_v26, 1.0  ;;  %v2535_v59 = vadd.f32 0.87758255, %v2462_v18 }
 0x596   : > { %2072 = vrsqrt.f32 %v2470_v23  ;;  %v2483_v33 = vpop.f32.mrb[13].mxu0  ;;  %v1306_v36 = vsub.f32 1.0, %v1298_v25  ;;  %v1292_v41 = vmul.f32 %v2478_v30, %v2478_v30  ;;  %vm1328_vm11 = vcmp.eq.f32.partialorder %v2470_v23, inf }
 0x597   : > { %2074 = vrsqrt.f32 %v2486_v35  ;;  %v1305_v49 = vsub.f32 1.0, %v1297_v37  ;;  %v1291_v47 = vmul.f32 %v2483_v33, %v2483_v33  ;;  %vm1330_vm12 = vcmp.eq.f32.partialorder %v2470_v23, 0.0 }
 0x598   : > { %v2506_v48 = vadd.f32 1e-06, %v1306_v36  ;;  %v1300_v50 = vmin.f32 %v1292_v41, 1.0  ;;  %v1331_v7 = vand.u32 2147483648, %v2470_v23  ;;  %v2551_v10 = vadd.f32 -0.23971277, %v2462_v18 }
 0x599   : > { %v2502_v45 = vpop.f32.mrb[14].mxu0  ;;  %v2527_v53 = vadd.f32 1e-06, %v1305_v49  ;;  %v1299_v63 = vmin.f32 %v1291_v47, 1.0  ;;  %v2554_v6 = vmul.f32 0.87758255, %v2478_v30  ;;  %v2576_v26 = vmul.f32 %v2478_v30, %v1502_v38 }
 0x59a   : > { %v2508_v51 = vpop.f32.mrb[15].mxu0  ;;  %2076 = vrsqrt.f32 %v2506_v48  ;;  %v1308_v54 = vsub.f32 1.0, %v1300_v50  ;;  %v1294_v4 = vmul.f32 %v2502_v45, %v2502_v45  ;;  %v2557_v11 = vadd.f32 0.87758255, %v2478_v30 }
 0x59b   : > { %2078 = vrsqrt.f32 %v2527_v53  ;;  %v1307_v9 = vsub.f32 1.0, %v1299_v63  ;;  %vm1321_vm14 = vcmp.eq.f32.partialorder %v2486_v35, inf  ;;  %vm1323_vm15 = vcmp.eq.f32.partialorder %v2486_v35, 0.0 }
 0x59c   : > { %v2547_v8 = vadd.f32 1e-06, %v1308_v54  ;;  %v1302_v1 = vmin.f32 %v1294_v4, 1.0  ;;  %v1324_v14 = vand.u32 2147483648, %v2486_v35  ;;  %v2568_v17 = vadd.f32 -0.23971277, %v2478_v30 }
 0x59d   : > { %v2570_v18 = vadd.f32 1e-06, %v1307_v9  ;;  %v1293_v27 = vmul.f32 %v2508_v51, %v2508_v51  ;;  %vm1342_vm1 = vcmp.eq.f32.partialorder %v2506_v48, inf  ;;  %v2583_v31 = vmul.f32 0.87758255, %v2483_v33 }
 0x59e   : > { %2080 = vrsqrt.f32 %v2547_v8  ;;  %v1310_v22 = vsub.f32 1.0, %v1302_v1  ;;  %vm1344_vm2 = vcmp.eq.f32.partialorder %v2506_v48, 0.0  ;;  %vm1410_vm3 = vcmp.gt.f32.partialorder %v2523_v61, 0.0 }
 0x59f   : > { %2082 = vrsqrt.f32 %v2570_v18  ;;  %v1301_v36 = vmin.f32 %v1293_v27, 1.0  ;;  %v1345_v49 = vand.u32 2147483648, %v2506_v48  ;;  %v2598_v47 = vadd.f32 0.87758255, %v2483_v33 }
 0x5a0   : > { %v2073_v5 = vpop.eup %2072  ;;  %v2590_v30 = vadd.f32 1e-06, %v1310_v22  ;;  %v2601_v54 = vadd.f32 -0.23971277, %v2483_v33  ;;  %vm1335_vm4 = vcmp.eq.f32.partialorder %v2527_v53, inf  ;;  %vm1409_vm5 = vcmp.gt.f32.partialorder %v2535_v59, 0.0 }
 0x5a1   : > { %v1327_v2 = vmul.f32 %v2073_v5, %v2470_v23  ;;  %v2075_v15 = vpop.eup %2074  ;;  %v1309_v4 = vsub.f32 1.0, %v1301_v36  ;;  %vm1337_vm6 = vcmp.eq.f32.partialorder %v2527_v53, 0.0  ;;  %v1338_v1 = vand.u32 2147483648, %v2527_v53 }
 0x5a2   : > { %v1320_v25 = vmul.f32 %v2075_v15, %v2486_v35  ;;  %2084 = vrsqrt.f32 %v2590_v30  ;;  %vm1356_vm7 = vcmp.eq.f32.partialorder %v2547_v8, inf  ;;  %vm1412_vm8 = vcmp.gt.f32.partialorder %v2557_v11, 0.0 }
 0x5a3   : > { %v1329_v16 = vsel %vm1328_vm11, %v2470_v23, %v1327_v2  ;;  %v2619_v2 = vadd.f32 1e-06, %v1309_v4  ;;  %vm1358_vm9 = vcmp.eq.f32.partialorder %v2547_v8, 0.0  ;;  %vm1349_vm10 = vcmp.eq.f32.partialorder %v2570_v18, inf }
 0x5a4   : > { %v1332_v24 = vsel %vm1330_vm12, %v1331_v7, %v1329_v16  ;;  %v2077_v32 = vpop.eup %2076  ;;  %v1322_v23 = vsel %vm1321_vm14, %v2486_v35, %v1320_v25  ;;  %vm1351_vm11 = vcmp.eq.f32.partialorder %v2570_v18, 0.0  ;;  %vm1370_vm12 = vcmp.eq.f32.partialorder %v2590_v30, inf }
 0x5a5   : > { %v1384_v28 = vmul.f32 0.47942555, %v1332_v24  ;;  %v1325_v38 = vsel %vm1323_vm15, %v1324_v14, %v1322_v23  ;;  %v1341_v41 = vmul.f32 %v2077_v32, %v2506_v48  ;;  %v2079_v63 = vpop.eup %2078  ;;  %2086 = vrsqrt.f32 %v2619_v2 }
 0x5a6   : > { %v1383_v50 = vmul.f32 0.47942555, %v1325_v38  ;;  %v1334_v42 = vmul.f32 %v2079_v63, %v2527_v53  ;;  %vm1411_vm14 = vcmp.gt.f32.partialorder %v2598_v47, 0.0  ;;  %v1704_v47 = vadd.f32 -0.23971277, %v2502_v45 }
 0x5a7   : > { %v1392_v37 = vsub.f32 %v2489_v39, %v1384_v28  ;;  %v1343_v35 = vsel %vm1342_vm1, %v2506_v48, %v1341_v41  ;;  %vm1365_vm1 = vcmp.eq.f32.partialorder %v2619_v2, 0.0 }
 0x5a8   : > { %v1391_v7 = vsub.f32 %v2510_v52, %v1383_v50  ;;  %v1346_v9 = vsel %vm1344_vm2, %v1345_v49, %v1343_v35  ;;  %v2081_v14 = vpop.eup %2080  ;;  %v1336_v52 = vsel %vm1335_vm4, %v2527_v53, %v1334_v42  ;;  %v1359_v53 = vand.u32 2147483648, %v2547_v8 }
 0x5a9   : > { %v1424_v39 = vsel %vm1408_vm13, %v1392_v37, %v2497_v43  ;;  %v1386_v43 = vmul.f32 0.47942555, %v1346_v9  ;;  %v1339_v16 = vsel %vm1337_vm6, %v1338_v1, %v1336_v52  ;;  %v1355_v55 = vmul.f32 %v2081_v14, %v2547_v8  ;;  %v2083_v24 = vpop.eup %2082 }
 0x5aa   : > { %v1490_v5 = vmul.f32 %v2458_v12, %v1424_v39  ;;  %v1423_v12 = vsel %vm1407_vm0, %v1391_v7, %v2514_v56  ;;  %v1385_v22 = vmul.f32 0.47942555, %v1339_v16  ;;  %v1348_v23 = vmul.f32 %v2083_v24, %v2570_v18 }
 0x5ab   : > { %v1489_v48 = vmul.f32 %v2460_v13, %v1423_v12  ;;  %v1357_v13 = vsel %vm1356_vm7, %v2547_v8, %v1355_v55  ;;  %vm1372_vm13 = vcmp.eq.f32.partialorder %v2590_v30, 0.0  ;;  %v1696_v35 = vadd.f32 0.87758255, %v2502_v45 }
 0x5ac   : > { %v1514_v15 = vadd.f32 %v2504_v46, %v1490_v5  ;;  %v1394_v46 = vsub.f32 %v2521_v58, %v1386_v43  ;;  %v1393_v28 = vsub.f32 %v2532_v3, %v1385_v22  ;;  %v1360_v32 = vsel %vm1358_vm9, %v1359_v53, %v1357_v13  ;;  %v2085_v61 = vpop.eup %2084 }
 0x5ad   : > { %v1513_v25 = vadd.f32 %v2518_v57, %v1489_v48  ;;  %v1388_v37 = vmul.f32 0.47942555, %v1360_v32  ;;  %v1352_v57 = vand.u32 2147483648, %v2570_v18  ;;  %v1369_v49 = vmul.f32 %v2085_v61, %v2590_v30 }
 0x5ae   : > { %v1522_v56 = vmul.f32 32.0, %v1514_v15  ;;  %v1426_v27 = vsel %vm1410_vm3, %v1394_v46, %v2525_v62  ;;  %v1425_v8 = vsel %vm1409_vm5, %v1393_v28, %v2551_v10  ;;  %v1504_v5 = vsub.f32 1.0, %v2500_v44 }
 0x5af   : > { %v1492_v58 = vmul.f32 %v2466_v20, %v1426_v27  ;;  %v1521_v36 = vmul.f32 32.0, %v1513_v25  ;;  %v1350_v20 = vsel %vm1349_vm10, %v2570_v18, %v1348_v23  ;;  %v1491_v3 = vmul.f32 %v2464_v19, %v1425_v8 }
 0x5b0   : > { %1530 = vst [vmem:[%s2632_s15 + $0x8] sm:$0xff] %v1522_v56  ;;  %v1396_v38 = vsub.f32 %v2554_v6, %v1388_v37  ;;  %v1353_v41 = vsel %vm1351_vm11, %v1352_v57, %v1350_v20  ;;  %v1371_v18 = vsel %vm1370_vm12, %v2590_v30, %v1369_v49  ;;  %vm1414_vm15 = vcmp.gt.f32.partialorder %v1696_v35, 0.0 }
 0x5b1   : > { %v1516_v62 = vadd.f32 %v2529_v0, %v1492_v58  ;;  %1529 = vst [vmem:[%s2632_s15] sm:$0xff] %v1521_v36  ;;  %v1387_v63 = vmul.f32 0.47942555, %v1353_v41  ;;  %v1373_v0 = vand.u32 2147483648, %v2590_v30  ;;  %v1515_v59 = vadd.f32 %v2543_v60, %v1491_v3 }
 0x5b2   : > { %v1428_v10 = vsel %vm1412_vm8, %v1396_v38, %v2568_v17  ;;  %v1382_v60 = vmul.f32 0.87758255, %v2502_v45  ;;  %v2087_v17 = vpop.eup %2086  ;;  %vm1363_vm0 = vcmp.eq.f32.partialorder %v2619_v2, inf  ;;  %v1695_v15 = vadd.f32 0.87758255, %v2508_v51 }
 0x5b3   : > { %v1524_v50 = vmul.f32 32.0, %v1516_v62  ;;  %v1494_v19 = vmul.f32 %v2476_v29, %v1428_v10  ;;  %v1395_v6 = vsub.f32 %v2583_v31, %v1387_v63  ;;  %v1374_v39 = vsel %vm1372_vm13, %v1373_v0, %v1371_v18 }
 0x5b4   : > { %v1523_v4 = vmul.f32 32.0, %v1515_v59  ;;  %v1390_v11 = vmul.f32 0.47942555, %v1374_v39  ;;  %v1509_v29 = vmul.f32 %v1501_v34, %v2483_v33  ;;  %v1362_v42 = vmul.f32 %v2087_v17, %v2619_v2 }
 0x5b5   : > { %1532 = vst [vmem:[%s2632_s15 + $0x18] sm:$0xff] %v1524_v50  ;;  %v1518_v7 = vadd.f32 %v2576_v26, %v1494_v19  ;;  %v1427_v30 = vsel %vm1411_vm14, %v1395_v6, %v2601_v54  ;;  %v1366_v26 = vand.u32 2147483648, %v2619_v2  ;;  %v1512_v33 = vmul.f32 %v2502_v45, %v1504_v5 }
 0x5b6   : > { %1531 = vst [vmem:[%s2632_s15 + $0x10] sm:$0xff] %v1523_v4  ;;  %v1493_v31 = vmul.f32 %v2468_v21, %v1427_v30  ;;  %v1398_v9 = vsub.f32 %v1382_v60, %v1390_v11  ;;  %v1364_v14 = vsel %vm1363_vm0, %v2619_v2, %v1362_v42  ;;  %v1381_v52 = vmul.f32 0.87758255, %v2508_v51 }
 0x5b7   : > { %v1526_v43 = vmul.f32 32.0, %v1518_v7  ;;  %v1367_v34 = vsel %vm1365_vm1, %v1366_v26, %v1364_v14  ;;  %v1503_v46 = vsub.f32 1.0, %v2491_v40  ;;  %v1703_v2 = vadd.f32 -0.23971277, %v2508_v51 }
 0x5b8   : > { %v1517_v54 = vadd.f32 %v1509_v29, %v1493_v31  ;;  %v1430_v1 = vsel %vm1414_vm15, %v1398_v9, %v1704_v47  ;;  %v1389_v48 = vmul.f32 0.47942555, %v1367_v34  ;;  %vm1413_vm2 = vcmp.gt.f32.partialorder %v1695_v15, 0.0 }
 0x5b9   : > { %1534 = vst [vmem:[%s2632_s15 + $0x28] sm:$0xff] %v1526_v43  ;;  %v1496_v21 = vmul.f32 %v2500_v44, %v1430_v1  ;;  %v1511_v22 = vmul.f32 %v1503_v46, %v2508_v51 }
 0x5ba   : > { %v1525_v12 = vmul.f32 32.0, %v1517_v54  ;;  %v1397_v55 = vsub.f32 %v1381_v52, %v1389_v48 }
 0x5bb   : > { %v1520_v16 = vadd.f32 %v1512_v33, %v1496_v21 }
 0x5bc   : > { %1533 = vst [vmem:[%s2632_s15 + $0x20] sm:$0xff] %v1525_v12  ;;  %v1429_v44 = vsel %vm1413_vm2, %v1397_v55, %v1703_v2 }
 0x5bd   : > { %v1528_v56 = vmul.f32 32.0, %v1520_v16  ;;  %v1495_v45 = vmul.f32 %v2491_v40, %v1429_v44 }
 0x5bf   : > { %1536 = vst [vmem:[%s2632_s15 + $0x38] sm:$0xff] %v1528_v56  ;;  %v1519_v53 = vadd.f32 %v1511_v22, %v1495_v45 }
 0x5c1   : > { %v1527_v24 = vmul.f32 32.0, %v1519_v53 }
 0x5c3   : > { %1535 = vst [vmem:[%s2632_s15 + $0x30] sm:$0xff] %v1527_v24 }
 0x5c4 PF: > { %s23_s21 = sadd.s32 1, %s2094_s21  }
 0x5c5   : > { %p20_p4 = scmp.ge.s32.totalorder %s23_s21, 4  }
 0x5c7   :  { %22 = sbr.rel (!%p20_p4) target bundleno = 1 (0x1), region = 109 }

</bundles_post_ra>
